<compile_context>
chip_gen: v6e
topology: v6e:2x2x1
jax: 0.10.0
libtpu: 0.0.40
codegen_flags: <defaults>
</compile_context>

<pallas_src>
import functools

import jax
import jax.numpy as jnp
from jax.experimental import pallas as pl
from jax.experimental.pallas import tpu as pltpu

KH = KW = 4
STRIDE = 2
PAD = 1
BN_EPS = 1e-5
LANE = 128
SUBLANE = 8


def _round_up(x, m):
    return ((x + m - 1) // m) * m


def _cdiv(a, b):
    return -(-a // b)


# ---------------------------------------------------------------------------
# Pass 1: conv-as-matmul (K-tiled, f32 VMEM accumulator) + per-channel partial
# statistics.  No bias and no masking: zero-padded patch rows contribute
# exactly 0 to both the accumulator and the statistics.
# ---------------------------------------------------------------------------
def _conv_stats_kernel(p_ref, w_ref, y_ref, stat_ref, acc_ref, *, cout):
    k = pl.program_id(1)

    @pl.when(k == 0)
    def _():
        acc_ref[...] = jnp.zeros_like(acc_ref)

    acc_ref[...] += jnp.dot(p_ref[...], w_ref[...],
                            preferred_element_type=jnp.float32)

    @pl.when(k == pl.num_programs(1) - 1)
    def _():
        y = acc_ref[...][:, :cout]                     # (tm, Cout) f32
        y_ref[...] = y.astype(y_ref.dtype)             # compute-dtype y intermediate
        stat_ref[0, 0:1, :] = jnp.sum(y, axis=0, keepdims=True)
        stat_ref[0, 1:2, :] = jnp.sum(y * y, axis=0, keepdims=True)


# ---------------------------------------------------------------------------
# Pass 2: folded BatchNorm affine + ELU.
# ---------------------------------------------------------------------------
def _bn_elu_kernel(y_ref, scale_ref, shift_ref, o_ref):
    yn = y_ref[...].astype(jnp.float32) * scale_ref[...] + shift_ref[...]
    # ELU(alpha=1).  exp runs on the EUP (free slot); exp(x)-1 vs expm1 abs
    # error near 0 is < ~1e-7.
    o_ref[...] = jnp.where(yn > 0, yn, jnp.exp(yn) - 1.0)


# ---------------------------------------------------------------------------
# Wrapper glue: reflect pad + im2col (index shuffling only, already in the
# compute dtype and already lane-padded along K via the channel pad of x).
# ---------------------------------------------------------------------------
def _im2col_reflect(x):
    """x: (N, C, H, W) -> patches (N*Ho*Wo, C*KH*KW) in x.dtype, plus (Ho, Wo)."""
    N, C, H, W = x.shape
    Ho = (H + 2 * PAD - KH) // STRIDE + 1
    Wo = (W + 2 * PAD - KW) // STRIDE + 1
    xp = jnp.pad(x, ((0, 0), (0, 0), (PAD, PAD), (PAD, PAD)), mode="reflect")
    taps = []
    for kh in range(KH):
        for kw in range(KW):
            taps.append(xp[:, :,
                           kh: kh + STRIDE * Ho: STRIDE,
                           kw: kw + STRIDE * Wo: STRIDE])      # (N, C, Ho, Wo)
    pat = jnp.stack(taps, axis=-1)                             # (N, C, Ho, Wo, 16)
    pat = jnp.transpose(pat, (0, 2, 3, 1, 4))                  # (N, Ho, Wo, C, 16)
    return pat.reshape(N * Ho * Wo, C * KH * KW), (Ho, Wo)


def conv_block_forward(x, weight, bias, gamma, beta, *,
                       compute_dtype=jnp.bfloat16, out_layout="NCHW"):
    """x: (N, Cin, H, W) f32 NCHW.  Returns (N, Cout, Ho, Wo) (or NHWC).

    `bias` is accepted for API parity but is mathematically a no-op here: the
    train-mode BatchNorm that follows subtracts the per-channel batch mean, so
    any per-channel constant added by the conv cancels exactly.
    """
    del bias
    N, Cin, H, W = x.shape
    Cout = weight.shape[0]
    K = Cin * KH * KW
    Kp = _round_up(K, LANE)                    # lane-dense K panels for the MXU
    Cp = _round_up(Cout, LANE)                 # MXU column width (padded weight only)
    Cin_p = Kp // (KH * KW)                    # Kp % 16 == 0, so exact
    in_bytes = jnp.dtype(compute_dtype).itemsize

    # im2col on cast + channel-padded x (tiny extra bytes on the small array, no
    # second pass over the 16x-expanded patch matrix).
    xc = jnp.pad(x.astype(compute_dtype),
                 ((0, 0), (0, Cin_p - Cin), (0, 0), (0, 0)))
    patches, (Ho, Wo) = _im2col_reflect(xc)    # (M, Kp), compute dtype
    M = N * Ho * Wo

    # ---- generation-aware VMEM budget ---------------------------------------
    try:
        vmem_cap = int(getattr(pltpu.get_tpu_info(), "vmem_capacity_bytes",
                               64 << 20))
    except Exception:
        vmem_cap = 64 << 20                    # conservative fallback
    tile_budget = max(8 << 20, int(0.45 * vmem_cap))   # ~57MiB v5e/v6e, ~28MiB v7x

    # ---- K tiling: keep the (double-buffered) weight panel under ~1/4 of the
    # budget instead of shrinking the M tile toward SUBLANE.
    ndiv = Kp // LANE
    w_quarter = max(tile_budget // 4, 2 * LANE * Cp * in_bytes)
    tk = LANE
    for d in range(ndiv, 0, -1):
        if ndiv % d == 0 and 2 * (d * LANE) * Cp * in_bytes <= w_quarter:
            tk = d * LANE
            break
    nk = Kp // tk

    # ---- M tiling: as large as the remaining budget allows (amortizes the
    # ~0.35us/grid-step overhead), but >= 2 tiles (even when cheap) for megacore.
    per_row = 2 * tk * in_bytes + 2 * Cout * in_bytes + Cp * 4
    avail = tile_budget - 2 * tk * Cp * in_bytes - (1 << 20)
    tm_cap = max(SUBLANE, min(2048, (avail // per_row) // SUBLANE * SUBLANE))
    tm = max(SUBLANE, min(tm_cap, _round_up(M, SUBLANE)))
    nt = _cdiv(M, tm)
    if nt < 2 and M > SUBLANE:
        tm = _round_up(_cdiv(M, 2), SUBLANE)
        nt = _cdiv(M, tm)
    if nt > 1 and nt % 2 == 1:                 # prefer an even tile count (v7x: 2 TCs)
        tm_alt = _round_up(_cdiv(M, nt + 1), SUBLANE)
        if tm_alt >= SUBLANE and _cdiv(M, tm_alt) % 2 == 0:
            tm, nt = tm_alt, _cdiv(M, tm_alt)
    Mp = nt * tm

    # ---- Pass-2 M tile: pure HBM stream with a tiny footprint -> bigger tiles.
    tm2 = tm
    per_row2 = 2 * Cout * (in_bytes + 4) + 64
    while (tm2 * 2 <= 4096 and Mp % (tm2 * 2) == 0
           and Mp // (tm2 * 2) >= 2 and (tm2 * 2) * per_row2 <= tile_budget):
        tm2 *= 2
    nt2 = Mp // tm2

    est1 = (2 * tm * tk * in_bytes + 2 * tk * Cp * in_bytes
            + 2 * tm * Cout * in_bytes + tm * Cp * 4 + 16 * Cout * 4)
    est2 = 2 * tm2 * Cout * (in_bytes + 4) + 16 * Cout * 4
    vmem_limit = int(min(0.72 * vmem_cap,
                         max(2 * max(est1, est2) + (2 << 20), 32 << 20)))
    cparams1 = pltpu.CompilerParams(
        dimension_semantics=("parallel", "arbitrary"),
        vmem_limit_bytes=vmem_limit)
    cparams2 = pltpu.CompilerParams(
        dimension_semantics=("parallel",),
        vmem_limit_bytes=vmem_limit)

    # ---- operands ------------------------------------------------------------
    p = jnp.pad(patches, ((0, Mp - M), (0, 0)))      # zero rows: no-op in stats
    wmat = jnp.pad(weight.reshape(Cout, K).T,
                   ((0, Kp - K), (0, Cp - Cout))).astype(compute_dtype)

    # ---- Pass 1: conv matmul + per-tile partial stats -------------------------
    # TODO(synk): single-buffer the constant-index weight panel (pl.Buffered(1))
    # once confirmed on the target toolchain; it frees Kp*Cp*in_bytes of VMEM.
    y, stats = pl.pallas_call(
        functools.partial(_conv_stats_kernel, cout=Cout),
        out_shape=(
            jax.ShapeDtypeStruct((Mp, Cout), compute_dtype),
            jax.ShapeDtypeStruct((nt, 2, Cout), jnp.float32),
        ),
        grid=(nt, nk),
        in_specs=[
            pl.BlockSpec((tm, tk), lambda i, k: (i, k)),
            pl.BlockSpec((tk, Cp), lambda i, k: (k, 0)),
        ],
        out_specs=(
            pl.BlockSpec((tm, Cout), lambda i, k: (i, 0)),
            pl.BlockSpec((1, 2, Cout), lambda i, k: (i, 0, 0)),
        ),
        scratch_shapes=[pltpu.VMEM((tm, Cp), jnp.float32)],
        compiler_params=cparams1,
    )(p, wmat)

    # ---- tiny cross-tile reduction + folded BN affine (Cout floats, plain JAX)
    ssum = jnp.sum(stats[:, 0, :], axis=0)
    ssq = jnp.sum(stats[:, 1, :], axis=0)
    mean = ssum / M
    var = jnp.maximum(ssq / M - mean * mean, 0.0)    # biased var == PyTorch train mode
    scale = gamma.astype(jnp.float32) * jax.lax.rsqrt(var + BN_EPS)
    shift = beta.astype(jnp.float32) - mean * scale

    # ---- Pass 2: normalize + ELU ----------------------------------------------
    out_flat = pl.pallas_call(
        _bn_elu_kernel,
        out_shape=jax.ShapeDtypeStruct((Mp, Cout), jnp.float32),
        grid=(nt2,),
        in_specs=[
            pl.BlockSpec((tm2, Cout), lambda i: (i, 0)),
            pl.BlockSpec((1, Cout), lambda i: (0, 0)),
            pl.BlockSpec((1, Cout), lambda i: (0, 0)),
        ],
        out_specs=pl.BlockSpec((tm2, Cout), lambda i: (i, 0)),
        compiler_params=cparams2,
    )(y, scale.reshape(1, Cout), shift.reshape(1, Cout))

    out = out_flat[:M].reshape(N, Ho, Wo, Cout)      # already true-Cout width
    if out_layout == "NHWC":
        return out
    return jnp.transpose(out, (0, 3, 1, 2))          # NCHW to match the module


def conv_block_reference(x, weight, bias, gamma, beta):
    """Pure-JAX f32 reference (includes the bias, which cancels through BN)."""
    xp = jnp.pad(x, ((0, 0), (0, 0), (PAD, PAD), (PAD, PAD)), mode="reflect")
    y = jax.lax.conv_general_dilated(
        xp, weight, window_strides=(STRIDE, STRIDE), padding="VALID",
        dimension_numbers=("NCHW", "OIHW", "NCHW"))
    y = y + bias[None, :, None, None]
    mean = y.mean(axis=(0, 2, 3), keepdims=True)
    var = ((y - mean) ** 2).mean(axis=(0, 2, 3), keepdims=True)
    yn = (y - mean) / jnp.sqrt(var + BN_EPS)
    yn = yn * gamma[None, :, None, None] + beta[None, :, None, None]
    return jnp.where(yn > 0, yn, jnp.exp(yn) - 1.0)


if __name__ == "__main__":
    key = jax.random.PRNGKey(0)
    k_x, k_w, k_b, k_g, k_be = jax.random.split(key, 5)

    N, Cin, H, W = 2, 4, 16, 16
    Cout = 8

    x = jax.random.normal(k_x, (N, Cin, H, W), dtype=jnp.float32)
    weight = jax.random.normal(k_w, (Cout, Cin, KH, KW), dtype=jnp.float32) * 0.1
    bias = jax.random.normal(k_b, (Cout,), dtype=jnp.float32) * 0.1
    gamma = 1.0 + 0.1 * jax.random.normal(k_g, (Cout,), dtype=jnp.float32)
    beta = 0.1 * jax.random.normal(k_be, (Cout,), dtype=jnp.float32)

    ref = conv_block_reference(x, weight, bias, gamma, beta)
    fwd = jax.jit(conv_block_forward,
                  static_argnames=("compute_dtype", "out_layout"))

    # Exact-precision path (f32 MXU operands, f32 y intermediate) — tight check.
    out_f32 = jax.block_until_ready(
        fwd(x, weight, bias, gamma, beta, compute_dtype=jnp.float32))
    assert out_f32.shape == (N, Cout, H // 2, W // 2)
    assert jnp.allclose(out_f32, ref, atol=2e-3, rtol=2e-3), \
        float(jnp.max(jnp.abs(out_f32 - ref)))

    # Default fast path (bf16 MXU operands, bf16 y intermediate, f32 stats/ELU).
    out_bf16 = jax.block_until_ready(fwd(x, weight, bias, gamma, beta))
    assert out_bf16.shape == (N, Cout, H // 2, W // 2)
    assert jnp.allclose(out_bf16, ref, atol=8e-2, rtol=8e-2), \
        float(jnp.max(jnp.abs(out_bf16 - ref)))

    print("KERNEL_OK")
</pallas_src>

<mosaic_0001>
module attributes {stable_mosaic.version = 11 : i64} {
  func.func @_conv_stats_kernel(%arg0: i32, %arg1: i32, %arg2: memref<64x128xf32, #tpu.memory_space<vmem>>, %arg3: memref<128x128xf32, #tpu.memory_space<vmem>>, %arg4: memref<64x8xf32, #tpu.memory_space<vmem>>, %arg5: memref<1x2x8xf32, #tpu.memory_space<vmem>>, %arg6: memref<64x128xf32, #tpu.memory_space<vmem>>) attributes {dimension_semantics = [#tpu.dimension_semantics<parallel>, #tpu.dimension_semantics<arbitrary>], iteration_bounds = array<i64: 2, 1>, scalar_prefetch = 0 : i64, scratch_operands = 1 : i64, tpu.core_type = #tpu.core_type<tc>, window_params = [{transform_indices = @transform_0, window_bounds = array<i64: 64, 128>}, {transform_indices = @transform_1, window_bounds = array<i64: 128, 128>}, {transform_indices = @transform_2, window_bounds = array<i64: 64, 8>}, {transform_indices = @transform_3, window_bounds = array<i64: 1, 2, 8>}]} {
    %c0_i32 = arith.constant 0 : i32
    %0 = arith.cmpi eq, %arg1, %c0_i32 : i32
    %1 = arith.extui %0 : i1 to i32
    %c0_i32_0 = arith.constant 0 : i32
    %2 = arith.cmpi ne, %1, %c0_i32_0 : i32
    scf.if %2 {
      %cst_10 = arith.constant 0.000000e+00 : f32
      %12 = vector.broadcast %cst_10 : f32 to vector<64x128xf32>
      %c0_11 = arith.constant 0 : index
      %c0_12 = arith.constant 0 : index
      %13 = vector.load %arg6[%c0_11, %c0_12] : memref<64x128xf32, #tpu.memory_space<vmem>>, vector<64x128xf32>
      tpu.vector_store %arg6[%c0_11, %c0_12], %12 {strides = array<i32>} : memref<64x128xf32, #tpu.memory_space<vmem>>, vector<64x128xf32>,
    } else {
    }
    %c0 = arith.constant 0 : index
    %c0_1 = arith.constant 0 : index
    %3 = vector.load %arg6[%c0, %c0_1] : memref<64x128xf32, #tpu.memory_space<vmem>>, vector<64x128xf32>
    %c0_2 = arith.constant 0 : index
    %c0_3 = arith.constant 0 : index
    %4 = vector.load %arg2[%c0_2, %c0_3] : memref<64x128xf32, #tpu.memory_space<vmem>>, vector<64x128xf32>
    %c0_4 = arith.constant 0 : index
    %c0_5 = arith.constant 0 : index
    %5 = vector.load %arg3[%c0_4, %c0_5] : memref<128x128xf32, #tpu.memory_space<vmem>>, vector<128x128xf32>
    %cst = arith.constant dense<0.000000e+00> : vector<64x128xf32>
    %6 = tpu.matmul %4, %5, %cst {dimension_numbers = #tpu.dot_dimension_numbers<[1], [0], [0], [1], [0, 0, 1, 1], [], []>} : vector<64x128xf32>, vector<128x128xf32>, vector<64x128xf32> -> vector<64x128xf32>
    %7 = arith.addf %3, %6 : vector<64x128xf32>
    %c0_6 = arith.constant 0 : index
    %c0_7 = arith.constant 0 : index
    %8 = vector.load %arg6[%c0_6, %c0_7] : memref<64x128xf32, #tpu.memory_space<vmem>>, vector<64x128xf32>
    tpu.vector_store %arg6[%c0_6, %c0_7], %7 {strides = array<i32>} : memref<64x128xf32, #tpu.memory_space<vmem>>, vector<64x128xf32>,
    %c0_i32_8 = arith.constant 0 : i32
    %9 = arith.cmpi eq, %arg1, %c0_i32_8 : i32
    %10 = arith.extui %9 : i1 to i32
    %c0_i32_9 = arith.constant 0 : i32
    %11 = arith.cmpi ne, %10, %c0_i32_9 : i32
    scf.if %11 {
      %c0_10 = arith.constant 0 : index
      %c0_11 = arith.constant 0 : index
      %12 = vector.load %arg6[%c0_10, %c0_11] : memref<64x128xf32, #tpu.memory_space<vmem>>, vector<64x128xf32>
      %13 = vector.extract_strided_slice %12 {offsets = [0, 0], sizes = [64, 8], strides = [1, 1]} : vector<64x128xf32> to vector<64x8xf32>
      %c0_12 = arith.constant 0 : index
      %c0_13 = arith.constant 0 : index
      %14 = vector.load %arg4[%c0_12, %c0_13] : memref<64x8xf32, #tpu.memory_space<vmem>>, vector<64x8xf32>
      tpu.vector_store %arg4[%c0_12, %c0_13], %13 {strides = array<i32>} : memref<64x8xf32, #tpu.memory_space<vmem>>, vector<64x8xf32>,
      %cst_14 = arith.constant dense<0.000000e+00> : vector<8xf32>
      %15 = vector.multi_reduction <add>, %13, %cst_14 [0] : vector<64x8xf32> to vector<8xf32>
      %16 = vector.shape_cast %15 : vector<8xf32> to vector<1x8xf32>
      %c0_15 = arith.constant 0 : index
      %c0_16 = arith.constant 0 : index
      %c0_17 = arith.constant 0 : index
      %17 = vector.load %arg5[%c0_15, %c0_16, %c0_17] : memref<1x2x8xf32, #tpu.memory_space<vmem>>, vector<1x1x8xf32>
      %18 = vector.shape_cast %17 : vector<1x1x8xf32> to vector<1x8xf32>
      %19 = vector.shape_cast %16 : vector<1x8xf32> to vector<1x1x8xf32>
      tpu.vector_store %arg5[%c0_15, %c0_16, %c0_17], %19 {strides = array<i32>} : memref<1x2x8xf32, #tpu.memory_space<vmem>>, vector<1x1x8xf32>,
      %20 = arith.mulf %13, %13 : vector<64x8xf32>
      %cst_18 = arith.constant dense<0.000000e+00> : vector<8xf32>
      %21 = vector.multi_reduction <add>, %20, %cst_18 [0] : vector<64x8xf32> to vector<8xf32>
      %22 = vector.shape_cast %21 : vector<8xf32> to vector<1x8xf32>
      %c0_19 = arith.constant 0 : index
      %c1 = arith.constant 1 : index
      %c0_20 = arith.constant 0 : index
      %23 = vector.load %arg5[%c0_19, %c1, %c0_20] : memref<1x2x8xf32, #tpu.memory_space<vmem>>, vector<1x1x8xf32>
      %24 = vector.shape_cast %23 : vector<1x1x8xf32> to vector<1x8xf32>
      %25 = vector.shape_cast %22 : vector<1x8xf32> to vector<1x1x8xf32>
      tpu.vector_store %arg5[%c0_19, %c1, %c0_20], %25 {strides = array<i32>} : memref<1x2x8xf32, #tpu.memory_space<vmem>>, vector<1x1x8xf32>,
    } else {
    }
    return
  }
  func.func @transform_0(%arg0: i32, %arg1: i32) -> (i32, i32) {
    %c0_i32 = arith.constant 0 : i32
    return %arg0, %arg1 : i32, i32
  }
  func.func @transform_1(%arg0: i32, %arg1: i32) -> (i32, i32) {
    %c0_i32 = arith.constant 0 : i32
    %c0_i32_0 = arith.constant 0 : i32
    return %arg1, %c0_i32 : i32, i32
  }
  func.func @transform_2(%arg0: i32, %arg1: i32) -> (i32, i32) {
    %c0_i32 = arith.constant 0 : i32
    %c0_i32_0 = arith.constant 0 : i32
    return %arg0, %c0_i32 : i32, i32
  }
  func.func @transform_3(%arg0: i32, %arg1: i32) -> (i32, i32, i32) {
    %c0_i32 = arith.constant 0 : i32
    %c0_i32_0 = arith.constant 0 : i32
    %c0_i32_1 = arith.constant 0 : i32
    return %arg0, %c0_i32, %c0_i32_0 : i32, i32, i32
  }
}

module attributes {stable_mosaic.version = 11 : i64} {
  func.func @_bn_elu_kernel(%arg0: i32, %arg1: memref<64x8xf32, #tpu.memory_space<vmem>>, %arg2: memref<1x8xf32, #tpu.memory_space<vmem>>, %arg3: memref<1x8xf32, #tpu.memory_space<vmem>>, %arg4: memref<64x8xf32, #tpu.memory_space<vmem>>) attributes {dimension_semantics = [#tpu.dimension_semantics<parallel>], iteration_bounds = array<i64: 2>, scalar_prefetch = 0 : i64, scratch_operands = 0 : i64, tpu.core_type = #tpu.core_type<tc>, window_params = [{transform_indices = @transform_0, window_bounds = array<i64: 64, 8>}, {pipeline_mode = #tpu.pipeline_mode<synchronous>, transform_indices = @transform_1, window_bounds = array<i64: 1, 8>}, {pipeline_mode = #tpu.pipeline_mode<synchronous>, transform_indices = @transform_2, window_bounds = array<i64: 1, 8>}, {transform_indices = @transform_3, window_bounds = array<i64: 64, 8>}]} {
    %c0 = arith.constant 0 : index
    %c0_0 = arith.constant 0 : index
    %0 = vector.load %arg1[%c0, %c0_0] : memref<64x8xf32, #tpu.memory_space<vmem>>, vector<64x8xf32>
    %c0_1 = arith.constant 0 : index
    %c0_2 = arith.constant 0 : index
    %1 = vector.load %arg2[%c0_1, %c0_2] : memref<1x8xf32, #tpu.memory_space<vmem>>, vector<1x8xf32>
    %2 = vector.broadcast %1 : vector<1x8xf32> to vector<64x8xf32>
    %3 = arith.mulf %0, %2 : vector<64x8xf32>
    %c0_3 = arith.constant 0 : index
    %c0_4 = arith.constant 0 : index
    %4 = vector.load %arg3[%c0_3, %c0_4] : memref<1x8xf32, #tpu.memory_space<vmem>>, vector<1x8xf32>
    %5 = vector.broadcast %4 : vector<1x8xf32> to vector<64x8xf32>
    %6 = arith.addf %3, %5 : vector<64x8xf32>
    %cst = arith.constant 0.000000e+00 : f32
    %7 = vector.broadcast %cst : f32 to vector<64x8xf32>
    %8 = arith.cmpf ogt, %6, %7 : vector<64x8xf32>
    %9 = math.exp %6 : vector<64x8xf32>
    %cst_5 = arith.constant 1.000000e+00 : f32
    %10 = vector.broadcast %cst_5 : f32 to vector<64x8xf32>
    %11 = arith.subf %9, %10 : vector<64x8xf32>
    %12 = arith.select %8, %6, %11 : vector<64x8xi1>, vector<64x8xf32>
    %c0_6 = arith.constant 0 : index
    %c0_7 = arith.constant 0 : index
    %13 = vector.load %arg4[%c0_6, %c0_7] : memref<64x8xf32, #tpu.memory_space<vmem>>, vector<64x8xf32>
    tpu.vector_store %arg4[%c0_6, %c0_7], %12 {strides = array<i32>} : memref<64x8xf32, #tpu.memory_space<vmem>>, vector<64x8xf32>,
    return
  }
  func.func @transform_0(%arg0: i32) -> (i32, i32) {
    %c0_i32 = arith.constant 0 : i32
    %c0_i32_0 = arith.constant 0 : i32
    return %arg0, %c0_i32 : i32, i32
  }
  func.func @transform_1(%arg0: i32) -> (i32, i32) {
    %c0_i32 = arith.constant 0 : i32
    %c0_i32_0 = arith.constant 0 : i32
    %c0_i32_1 = arith.constant 0 : i32
    return %c0_i32, %c0_i32_0 : i32, i32
  }
  func.func @transform_2(%arg0: i32) -> (i32, i32) {
    %c0_i32 = arith.constant 0 : i32
    %c0_i32_0 = arith.constant 0 : i32
    %c0_i32_1 = arith.constant 0 : i32
    return %c0_i32, %c0_i32_0 : i32, i32
  }
  func.func @transform_3(%arg0: i32) -> (i32, i32) {
    %c0_i32 = arith.constant 0 : i32
    %c0_i32_0 = arith.constant 0 : i32
    return %arg0, %c0_i32 : i32, i32
  }
}

</mosaic_0001>

<bundles_post_ra>
// kernel: conv_block_forward.3
= control target key start
LH: loop header
LB: loop body
LE: loop exit
PB: predicated region body
PF: predicated region fallthrough
CT: control target
= control target key end

     0   :  { %s390_s12 = smov 0   ;;  %s438_s0 = inlined_call_operand.vmem [shape: f32[128,8], index: 0, kind: input, shape index: {}]   ;;  %s439_s1 = inlined_call_operand.vmem [shape: f32[1,8], index: 1, kind: input, shape index: {}]   ;;  %s440_s2 = inlined_call_operand.vmem [shape: f32[1,8], index: 2, kind: input, shape index: {}]   ;;  %s441_s3 = inlined_call_operand.vmem [shape: f32[128,8], index: 3, kind: output, shape index: {}]  }
   0x1 LB: > { %s317_s13 = sadd.s32 4294967295, %s368_s12   ;;  %p321_p0 = scmp.ge.s32.totalorder %s368_s12, 1  ;;  %s368_s12 = sphi %s390_s12, %s13_s12  }
   0x2   : > { %p138_p1 = scmp.lt.s32.totalorder %s368_s12, 3 }
   0x4   : > { %p139_p2 = pnand %p321_p0, %p138_p1 }
   0x5   : > { %s322_s14 = sshll.u32 (!%p139_p2), %s317_s13, 3 }
   0x6   : > { %142 = sbr.rel (%p139_p2) target bundleno = 46 (0x2e), region = 32  ;;  %p163_p3 = scmp.lt.s32.totalorder (!%p139_p2), %s322_s14, 15 }
   0xb   : > { %s443_s14 = smov (!%p163_p3, %s322_s14), 15  ;;  %v326_v0 = vld [vmem:[%s439_s1] ss:$0 sm:$0xff]  ;;  %vm252_vm1 = vcmask 64512  }
   0xc   : > { %s323_s15 = sshll.u32 %s443_s14, 3  ;;  %v327_v1 = vld [vmem:[%s440_s2] ss:$0 sm:$0xff] }
   0xd   : > { %s166_s20 = scalar_lea.vmem %s438_s0, %s323_s15  ;;  %s417_s25 = scalar_lea.vmem %s441_s3, %s323_s15 }
   0xe   : > { %v174_v2 = vld [vmem:[%s166_s20] sm:$0xff]  ;;  %v175_v3 = vld [vmem:[%s166_s20 + $0x8] sm:$0xff]  ;;  %v176_v4 = vld [vmem:[%s166_s20 + $0x10] sm:$0xff] }
   0xf   : > { %v189_v5 = vmul.f32 %v326_v0, %v174_v2  ;;  %v190_v6 = vmul.f32 %v326_v0, %v175_v3  ;;  %v191_v7 = vmul.f32 %v326_v0, %v176_v4  ;;  %v177_v8 = vld [vmem:[%s166_s20 + $0x18] sm:$0xff]  ;;  %v178_v9 = vld [vmem:[%s166_s20 + $0x20] sm:$0xff]  ;;  %v179_v10 = vld [vmem:[%s166_s20 + $0x28] sm:$0xff] }
  0x10   : > { %v192_v11 = vmul.f32 %v326_v0, %v177_v8  ;;  %v193_v12 = vmul.f32 %v326_v0, %v178_v9  ;;  %v194_v13 = vmul.f32 %v326_v0, %v179_v10  ;;  %v180_v14 = vld [vmem:[%s166_s20 + $0x30] sm:$0xff]  ;;  %v181_v15 = vld [vmem:[%s166_s20 + $0x38] sm:$0xff] }
  0x11   : > { %v204_v16 = vadd.f32 %v327_v1, %v189_v5  ;;  %v205_v17 = vadd.f32 %v327_v1, %v190_v6  ;;  %v206_v18 = vadd.f32 %v327_v1, %v191_v7  ;;  %v195_v19 = vmul.f32 %v326_v0, %v180_v14 }
  0x12   : > { %v207_v20 = vadd.f32 %v327_v1, %v192_v11  ;;  %v208_v21 = vadd.f32 %v327_v1, %v193_v12  ;;  %v209_v22 = vadd.f32 %v327_v1, %v194_v13  ;;  %v196_v23 = vmul.f32 %v326_v0, %v181_v15 }
  0x13   : > { %v220_v24 = vmul.f32 1.442695, %v204_v16  ;;  %v222_v25 = vmul.f32 1.442695, %v205_v17  ;;  %v224_v26 = vmul.f32 1.442695, %v206_v18  ;;  %v210_v30 = vadd.f32 %v327_v1, %v195_v19 }
  0x14   : > { %v226_v27 = vmul.f32 1.442695, %v207_v20  ;;  %v228_v28 = vmul.f32 1.442695, %v208_v21  ;;  %v230_v29 = vmul.f32 1.442695, %v209_v22  ;;  %v211_v31 = vadd.f32 %v327_v1, %v196_v23 }
  0x15   : > { %346 = vpow2.f32 %v220_v24  ;;  %v232_v32 = vmul.f32 1.442695, %v210_v30  ;;  %vm212_vm0 = vcmp.gt.f32.partialorder %v204_v16, 0.0  ;;  %vm213_vm2 = vcmp.gt.f32.partialorder %v205_v17, 0.0 }
  0x16   : > { %348 = vpow2.f32 %v222_v25  ;;  %v234_v33 = vmul.f32 1.442695, %v211_v31  ;;  %vm214_vm3 = vcmp.gt.f32.partialorder %v206_v18, 0.0  ;;  %vm215_vm4 = vcmp.gt.f32.partialorder %v207_v20, 0.0 }
  0x17   : > { %350 = vpow2.f32 %v224_v26  ;;  %vm216_vm5 = vcmp.gt.f32.partialorder %v208_v21, 0.0  ;;  %vm217_vm6 = vcmp.gt.f32.partialorder %v209_v22, 0.0  ;;  %vm218_vm7 = vcmp.gt.f32.partialorder %v210_v30, 0.0 }
  0x18   : > { %352 = vpow2.f32 %v226_v27  ;;  %vm219_vm8 = vcmp.gt.f32.partialorder %v211_v31, 0.0 }
  0x19   : > { %354 = vpow2.f32 %v228_v28 }
  0x1a   : > { %356 = vpow2.f32 %v230_v29 }
  0x1b   : > { %358 = vpow2.f32 %v232_v32 }
  0x1c   : > { %360 = vpow2.f32 %v234_v33 }
  0x22   : > { %v347_v34 = vpop.eup %346 }
  0x23   : > { %v349_v35 = vpop.eup %348  ;;  %v328_v36 = vadd.f32 -1.0, %v347_v34 }
  0x24   : > { %v351_v37 = vpop.eup %350  ;;  %v329_v38 = vadd.f32 -1.0, %v349_v35 }
  0x25   : > { %v353_v39 = vpop.eup %352  ;;  %v244_v40 = vsel %vm212_vm0, %v204_v16, %v328_v36  ;;  %v330_v41 = vadd.f32 -1.0, %v351_v37 }
  0x26   : > { %v355_v42 = vpop.eup %354  ;;  %253 = vst.msk [vmem:[%s417_s25] sm:$0xff] %vm252_vm1, %v244_v40  ;;  %v245_v43 = vsel %vm213_vm2, %v205_v17, %v329_v38  ;;  %v331_v44 = vadd.f32 -1.0, %v353_v39 }
  0x27   : > { %v357_v45 = vpop.eup %356  ;;  %254 = vst.msk [vmem:[%s417_s25 + $0x8] sm:$0xff] %vm252_vm1, %v245_v43  ;;  %v246_v46 = vsel %vm214_vm3, %v206_v18, %v330_v41  ;;  %v332_v47 = vadd.f32 -1.0, %v355_v42 }
  0x28   : > { %v359_v48 = vpop.eup %358  ;;  %255 = vst.msk [vmem:[%s417_s25 + $0x10] sm:$0xff] %vm252_vm1, %v246_v46  ;;  %v247_v49 = vsel %vm215_vm4, %v207_v20, %v331_v44  ;;  %v333_v50 = vadd.f32 -1.0, %v357_v45 }
  0x29   : > { %v361_v51 = vpop.eup %360  ;;  %256 = vst.msk [vmem:[%s417_s25 + $0x18] sm:$0xff] %vm252_vm1, %v247_v49  ;;  %v248_v52 = vsel %vm216_vm5, %v208_v21, %v332_v47  ;;  %v334_v53 = vadd.f32 -1.0, %v359_v48 }
  0x2a   : > { %257 = vst.msk [vmem:[%s417_s25 + $0x20] sm:$0xff] %vm252_vm1, %v248_v52  ;;  %v249_v54 = vsel %vm217_vm6, %v209_v22, %v333_v50  ;;  %v335_v55 = vadd.f32 -1.0, %v361_v51 }
  0x2b   : > { %258 = vst.msk [vmem:[%s417_s25 + $0x28] sm:$0xff] %vm252_vm1, %v249_v54  ;;  %v250_v56 = vsel %vm218_vm7, %v210_v30, %v334_v53 }
  0x2c   : > { %259 = vst.msk [vmem:[%s417_s25 + $0x30] sm:$0xff] %vm252_vm1, %v250_v56  ;;  %v251_v57 = vsel %vm219_vm8, %v211_v31, %v335_v55 }
  0x2d   : > { %260 = vst.msk [vmem:[%s417_s25 + $0x38] sm:$0xff] %vm252_vm1, %v251_v57 }
  0x2e PF: > { %s13_s12 = sadd.s32 1, %s368_s12  }
  0x2f   : > { %p10_p4 = scmp.ge.s32.totalorder %s13_s12, 4  }
  0x31   :  { %12 = sbr.rel (!%p10_p4) target bundleno = 1 (0x1), region = 62 }

// kernel: conv_block_forward.2
= control target key start
LH: loop header
LB: loop body
LE: loop exit
PB: predicated region body
PF: predicated region fallthrough
CT: control target
= control target key end

     0   :  { %s763_s12 = smov 0   ;;  %s765_s13 = smov 0   ;;  %s903_s0 = inlined_call_operand.vmem [shape: f32[128,128], index: 0, kind: input, shape index: {}]   ;;  %s904_s1 = inlined_call_operand.vmem [shape: f32[128,128], index: 1, kind: input, shape index: {}]   ;;  %s905_s2 = inlined_call_operand.vmem [shape: f32[128,8], index: 2, kind: output, shape index: {0}]   ;;  %s906_s3 = inlined_call_operand.vmem [shape: f32[2,2,8], index: 3, kind: output, shape index: {1}]  }
   0x1   :  { %s767_s14 = smov 0  }
   0x2 LB: > { %s26_s15 = sadd.s32 1, %s737_s13  ;;  %p587_p0 = scmp.ge.s32.totalorder %s741_s14, 1  ;;  %s741_s14 = sphi %s767_s14, %s14_s14   ;;  %s737_s13 = sphi %s765_s13, %s908_s13   ;;  %s733_s12 = sphi %s763_s12, %s907_s12  }
   0x3   : > { %p28_p1 = scmp.ge.s32.totalorder %s26_s15, 2  ;;  %p169_p2 = scmp.lt.s32.totalorder %s741_s14, 3 }
   0x5   : > { %s910_s15 = smov (%p28_p1, %s26_s15), 0  ;;  %p170_p3 = pnand %p587_p0, %p169_p2 }
   0x6   : > { %s588_s26 = sshll.u32 (!%p170_p3), %s733_s12, 3  ;;  %p226_p5 = scmp.lt.s32.totalorder (!%p170_p3), %s733_s12, 1 }
   0x7   : > { %173 = sbr.rel (%p170_p3) target bundleno = 272 (0x110), region = 28  ;;  %p206_p4 = scmp.lt.s32.totalorder (!%p170_p3), %s588_s26, 15 }
   0xc   : > { %v273_v0 = vld [vmem:[%s904_s1 + $0x78] sm:$0xff]  ;;  %v272_v1 = vld [vmem:[%s904_s1 + $0x70] sm:$0xff]  ;;  %v271_v2 = vld [vmem:[%s904_s1 + $0x68] sm:$0xff]  ;;  %s912_s26 = smov (!%p206_p4, %s588_s26), 15  ;;  %vm406_vm0 = vcmask 64512   ;;  %s914_s12 = smov (!%p226_p5, %s733_s12), 1 }
   0xd   : > { %619 = vmatprep.subr.mxu0 %v273_v0  ;;  %663 = vmatprep.subr.mxu1 %v273_v0  ;;  %v270_v3 = vld [vmem:[%s904_s1 + $0x60] sm:$0xff]  ;;  %v269_v4 = vld [vmem:[%s904_s1 + $0x58] sm:$0xff]  ;;  %v268_v5 = vld [vmem:[%s904_s1 + $0x50] sm:$0xff]  ;;  %s589_s16 = sshll.u32 %s912_s26, 3  ;;  %s592_s26 = sshll.u32 %s914_s12, 1  ;;  %vm436_vm1 = vcmask 57344  }
   0xe   : > { %620 = vmatpush3.msra.mxu0 %v273_v0  ;;  %679 = vmatpush3.msra.mxu1 %v273_v0  ;;  %v267_v6 = vld [vmem:[%s904_s1 + $0x48] sm:$0xff]  ;;  %v266_v7 = vld [vmem:[%s904_s1 + $0x40] sm:$0xff]  ;;  %v265_v8 = vld [vmem:[%s904_s1 + $0x38] sm:$0xff]  ;;  %s828_s21 = scalar_lea.vmem %s903_s0, %s589_s16  ;;  %s855_s6 = scalar_lea.vmem %s905_s2, %s589_s16 }
   0xf   : > { %621 = vmatprep.subr.mxu0 %v272_v1  ;;  %664 = vmatprep.subr.mxu1 %v272_v1  ;;  %v264_v9 = vld [vmem:[%s904_s1 + $0x30] sm:$0xff]  ;;  %v263_v10 = vld [vmem:[%s904_s1 + $0x28] sm:$0xff]  ;;  %v262_v11 = vld [vmem:[%s904_s1 + $0x20] sm:$0xff]  ;;  %s229_s9 = scalar_lea.vmem %s906_s3, %s592_s26 }
  0x10   : > { %622 = vmatpush3.msra.mxu0 %v272_v1  ;;  %680 = vmatpush3.msra.mxu1 %v272_v1  ;;  %v261_v12 = vld [vmem:[%s904_s1 + $0x18] sm:$0xff]  ;;  %v260_v13 = vld [vmem:[%s904_s1 + $0x10] sm:$0xff]  ;;  %v250_v14 = vld [vmem:[%s828_s21] sm:$0xff] }
  0x11   : > { %623 = vmatprep.subr.mxu0 %v271_v2  ;;  %665 = vmatprep.subr.mxu1 %v271_v2  ;;  %v259_v15 = vld [vmem:[%s904_s1 + $0x8] sm:$0xff]  ;;  %v258_v16 = vld [vmem:[%s904_s1] sm:$0xff]  ;;  %v252_v18 = vld [vmem:[%s828_s21 + $0x10] sm:$0xff] }
  0x12   : > { %624 = vmatpush3.msra.mxu0 %v271_v2  ;;  %681 = vmatpush3.msra.mxu1 %v271_v2  ;;  %v251_v17 = vld [vmem:[%s828_s21 + $0x8] sm:$0xff]  ;;  %v254_v19 = vld [vmem:[%s828_s21 + $0x20] sm:$0xff]  ;;  %v256_v21 = vld [vmem:[%s828_s21 + $0x30] sm:$0xff] }
  0x13   : > { %625 = vmatprep.subr.mxu0 %v270_v3  ;;  %666 = vmatprep.subr.mxu1 %v270_v3  ;;  %v255_v20 = vld [vmem:[%s828_s21 + $0x28] sm:$0xff]  ;;  %v253_v22 = vld [vmem:[%s828_s21 + $0x18] sm:$0xff] }
  0x14   : > { %626 = vmatpush3.msra.mxu0 %v270_v3  ;;  %682 = vmatpush3.msra.mxu1 %v270_v3  ;;  %v257_v23 = vld [vmem:[%s828_s21 + $0x38] sm:$0xff] }
  0x15   : > { %627 = vmatprep.subr.mxu0 %v269_v4  ;;  %667 = vmatprep.subr.mxu1 %v269_v4 }
  0x16   : > { %628 = vmatpush3.msra.mxu0 %v269_v4  ;;  %683 = vmatpush3.msra.mxu1 %v269_v4 }
  0x17   : > { %629 = vmatprep.subr.mxu0 %v268_v5  ;;  %668 = vmatprep.subr.mxu1 %v268_v5 }
  0x18   : > { %630 = vmatpush3.msra.mxu0 %v268_v5  ;;  %684 = vmatpush3.msra.mxu1 %v268_v5 }
  0x19   : > { %631 = vmatprep.subr.mxu0 %v267_v6  ;;  %669 = vmatprep.subr.mxu1 %v267_v6 }
  0x1a   : > { %632 = vmatpush3.msra.mxu0 %v267_v6  ;;  %685 = vmatpush3.msra.mxu1 %v267_v6 }
  0x1b   : > { %633 = vmatprep.subr.mxu0 %v266_v7  ;;  %670 = vmatprep.subr.mxu1 %v266_v7 }
  0x1c   : > { %634 = vmatpush3.msra.mxu0 %v266_v7  ;;  %686 = vmatpush3.msra.mxu1 %v266_v7 }
  0x1d   : > { %635 = vmatprep.subr.mxu0 %v265_v8  ;;  %671 = vmatprep.subr.mxu1 %v265_v8 }
  0x1e   : > { %636 = vmatpush3.msra.mxu0 %v265_v8  ;;  %687 = vmatpush3.msra.mxu1 %v265_v8 }
  0x1f   : > { %637 = vmatprep.subr.mxu0 %v264_v9  ;;  %672 = vmatprep.subr.mxu1 %v264_v9 }
  0x20   : > { %638 = vmatpush3.msra.mxu0 %v264_v9  ;;  %688 = vmatpush3.msra.mxu1 %v264_v9 }
  0x21   : > { %639 = vmatprep.subr.mxu0 %v263_v10  ;;  %673 = vmatprep.subr.mxu1 %v263_v10 }
  0x22   : > { %640 = vmatpush3.msra.mxu0 %v263_v10  ;;  %689 = vmatpush3.msra.mxu1 %v263_v10 }
  0x23   : > { %641 = vmatprep.subr.mxu0 %v262_v11  ;;  %674 = vmatprep.subr.mxu1 %v262_v11 }
  0x24   : > { %642 = vmatpush3.msra.mxu0 %v262_v11  ;;  %690 = vmatpush3.msra.mxu1 %v262_v11 }
  0x25   : > { %643 = vmatprep.subr.mxu0 %v261_v12  ;;  %675 = vmatprep.subr.mxu1 %v261_v12 }
  0x26   : > { %644 = vmatpush3.msra.mxu0 %v261_v12  ;;  %691 = vmatpush3.msra.mxu1 %v261_v12 }
  0x27   : > { %645 = vmatprep.subr.mxu0 %v260_v13  ;;  %651 = vmatprep.mubr.f32.mxu0 %v250_v14 }
  0x28   : > { %646 = vmatpush3.msra.mxu0 %v260_v13  ;;  %676 = vmatprep.subr.mxu1 %v260_v13 }
  0x29   : > { %647 = vmatprep.subr.mxu0 %v259_v15  ;;  %692 = vmatpush3.msra.mxu1 %v260_v13 }
  0x2a   : > { %648 = vmatpush3.msra.mxu0 %v259_v15  ;;  %677 = vmatprep.subr.mxu1 %v259_v15 }
  0x2b   : > { %649 = vmatprep.subr.mxu0 %v258_v16  ;;  %693 = vmatpush3.msra.mxu1 %v259_v15 }
  0x2c   : > { %650 = vmatpush3.msra.mxu0 %v258_v16  ;;  %678 = vmatprep.subr.mxu1 %v258_v16 }
  0x2d   : > { %652 = vmatmul.mubr.f32.vlgmr.msra.gmra.mxu0 %v251_v17  ;;  %694 = vmatpush3.msra.mxu1 %v258_v16 }
  0x2e   : > { %654 = vmatprep.mubr.f32.mxu0 %v252_v18  ;;  %657 = vmatprep.mubr.f32.mxu1 %v254_v19 }
  0x2f   : > { %658 = vmatmul.mubr.f32.vlgmr.msra.gmra.mxu1 %v255_v20 }
  0x30   : > { %660 = vmatprep.mubr.f32.mxu1 %v256_v21 }
  0x31   : > { %655 = vmatmul.mubr.f32.gmra.mxu0 %v253_v22 }
  0x33   : > { %661 = vmatmul.mubr.f32.gmra.mxu1 %v257_v23 }
  0xed   : > { %v653_v24 = vpop.f32.mrf.mxu0 }
  0xee   : > { %408 = vst.msk [vmem:[%s855_s6 + $0x8] sm:$0xff] %vm406_vm0, %v653_v24  ;;  %v439_v27 = vmul.f32 %v653_v24, %v653_v24  ;;  %v416_v32 = vsel %vm406_vm0, %v653_v24, 0.0 }
  0xef   : > { %v340_v25 = vpop.f32.mrf.mxu0  ;;  %v659_v26 = vpop.f32.mrf.mxu1 }
  0xf0   : > { %407 = vst.msk [vmem:[%s855_s6] sm:$0xff] %vm406_vm0, %v340_v25  ;;  %v415_v28 = vsel %vm406_vm0, %v340_v25, 0.0  ;;  %v438_v29 = vmul.f32 %v340_v25, %v340_v25  ;;  %412 = vst.msk [vmem:[%s855_s6 + $0x28] sm:$0xff] %vm406_vm0, %v659_v26  ;;  %v447_v37 = vsel %vm406_vm0, %v439_v27, 0.0  ;;  %v443_v50 = vmul.f32 %v659_v26, %v659_v26 }
  0xf1   : > { %v656_v30 = vpop.f32.mrf.mxu0  ;;  %v360_v31 = vpop.f32.mrf.mxu1  ;;  %v417_v34 = vadd.f32 %v416_v32, %v415_v28  ;;  %v424_v54 = vsel %vm406_vm0, %v659_v26, 0.0 }
  0xf2   : > { %v446_v33 = vsel %vm406_vm0, %v438_v29, 0.0  ;;  %410 = vst.msk [vmem:[%s855_s6 + $0x18] sm:$0xff] %vm406_vm0, %v656_v30  ;;  %411 = vst.msk [vmem:[%s855_s6 + $0x20] sm:$0xff] %vm406_vm0, %v360_v31  ;;  %v441_v38 = vmul.f32 %v656_v30, %v656_v30  ;;  %v420_v44 = vsel %vm406_vm0, %v656_v30, 0.0  ;;  %v442_v46 = vmul.f32 %v360_v31, %v360_v31 }
  0xf3   : > { %v350_v35 = vpop.f32.mrf.mxu0  ;;  %v662_v36 = vpop.f32.mrf.mxu1  ;;  %v448_v41 = vadd.f32 %v447_v37, %v446_v33  ;;  %v422_v51 = vsel %vm406_vm0, %v360_v31, 0.0  ;;  %v455_v59 = vsel %vm406_vm0, %v443_v50, 0.0 }
  0xf4   : > { %409 = vst.msk [vmem:[%s855_s6 + $0x10] sm:$0xff] %vm406_vm0, %v350_v35  ;;  %v418_v39 = vsel %vm406_vm0, %v350_v35, 0.0  ;;  %v440_v40 = vmul.f32 %v350_v35, %v350_v35  ;;  %414 = vst.msk [vmem:[%s855_s6 + $0x38] sm:$0xff] %vm406_vm0, %v662_v36  ;;  %v451_v49 = vsel %vm406_vm0, %v441_v38, 0.0  ;;  %v453_v55 = vsel %vm406_vm0, %v442_v46, 0.0 }
  0xf5   : > { %v419_v42 = vadd.f32 %v418_v39, %v417_v34  ;;  %v370_v43 = vpop.f32.mrf.mxu1  ;;  %v445_v60 = vmul.f32 %v662_v36, %v662_v36  ;;  %v428_v0 = vsel %vm406_vm0, %v662_v36, 0.0 }
  0xf6   : > { %v449_v45 = vsel %vm406_vm0, %v440_v40, 0.0  ;;  %413 = vst.msk [vmem:[%s855_s6 + $0x30] sm:$0xff] %vm406_vm0, %v370_v43  ;;  %v444_v56 = vmul.f32 %v370_v43, %v370_v43  ;;  %v426_v61 = vsel %vm406_vm0, %v370_v43, 0.0 }
  0xf7   : > { %v421_v47 = vadd.f32 %v420_v44, %v419_v42  ;;  %v450_v48 = vadd.f32 %v449_v45, %v448_v41  ;;  %v459_v4 = vsel %vm406_vm0, %v445_v60, 0.0 }
  0xf8   : > { %v457_v1 = vsel %vm406_vm0, %v444_v56, 0.0 }
  0xf9   : > { %v452_v52 = vadd.f32 %v451_v49, %v450_v48  ;;  %v423_v53 = vadd.f32 %v422_v51, %v421_v47 }
  0xfb   : > { %v454_v57 = vadd.f32 %v453_v55, %v452_v52  ;;  %v425_v58 = vadd.f32 %v424_v54, %v423_v53 }
  0xfd   : > { %v427_v62 = vadd.f32 %v426_v61, %v425_v58  ;;  %v456_v63 = vadd.f32 %v455_v59, %v454_v57 }
  0xff   : > { %v429_v2 = vadd.f32 %v428_v0, %v427_v62  ;;  %v458_v3 = vadd.f32 %v457_v1, %v456_v63 }
 0x101   : > { %v430_v5 = vrot.slane %v429_v2, 4  ;;  %v460_v6 = vadd.f32 %v459_v4, %v458_v3 }
 0x103   : > { %v431_v7 = vadd.f32 %v430_v5, %v429_v2  ;;  %v461_v8 = vrot.slane %v460_v6, 4 }
 0x105   : > { %v432_v9 = vrot.slane %v431_v7, 2  ;;  %v462_v10 = vadd.f32 %v461_v8, %v460_v6 }
 0x107   : > { %v433_v11 = vadd.f32 %v432_v9, %v431_v7  ;;  %v463_v12 = vrot.slane %v462_v10, 2 }
 0x109   : > { %v434_v13 = vrot.slane %v433_v11, 1  ;;  %v464_v14 = vadd.f32 %v463_v12, %v462_v10 }
 0x10b   : > { %v435_v15 = vadd.f32 %v434_v13, %v433_v11  ;;  %v465_v16 = vrot.slane %v464_v14, 1 }
 0x10d   : > { %437 = vst.msk [vmem:[%s229_s9] sm:$0x1] %vm436_vm1, %v435_v15  ;;  %v466_v17 = vadd.f32 %v465_v16, %v464_v14 }
 0x10f   : > { %467 = vst.msk [vmem:[%s229_s9 + $0x1] sm:$0x1] %vm436_vm1, %v466_v17 }
 0x110 PF: > { %s14_s14 = sadd.s32 1, %s741_s14   ;;  %s907_s12 = smov %s737_s13 }
 0x111   : > { %p11_p6 = scmp.ge.s32.totalorder %s14_s14, 4   ;;  %s908_s13 = smov %s910_s15 }
 0x113   :  { %13 = sbr.rel (!%p11_p6) target bundleno = 2 (0x2), region = 81 }

</bundles_post_ra>
